<compile_context>
chip_gen: v5e
topology: v5e:2x2
jax: 0.10.0
libtpu: 0.0.40
codegen_flags: <defaults>
</compile_context>

<pallas_src>
import math

import jax
import jax.numpy as jnp
from jax.experimental import pallas as pl
from jax.experimental.pallas import tpu as pltpu

LANE = 128
SUBLANE = 8


def _round_up(x, m):
    return ((x + m - 1) // m) * m


# ----------------------------------------------------------------------------
# Fused decoder kernel (one batch tile per grid step, all layers in VMEM)
# ----------------------------------------------------------------------------
def _make_decoder_kernel(num_hidden, act, n_valid_out):
    """Kernel ref order: x, (W_0,b_0), ..., (W_{L-1},b_{L-1}), W_x, b_x, out.

    Weights are lane-padded and have eval-mode BatchNorm folded in; padded
    input columns are zero so they contribute nothing to the matmuls.
    """

    def kernel(x_ref, *refs):
        o_ref = refs[-1]
        h = x_ref[...]
        idx = 0
        for _ in range(num_hidden):
            w = refs[idx][...]
            b = refs[idx + 1][...]
            idx += 2
            h = jnp.dot(h, w, preferred_element_type=jnp.float32) + b
            h = jnp.maximum(h, 0.0)  # ReLU (Dropout = identity in eval mode)
        wx = refs[idx][...]
        bx = refs[idx + 1][...]
        y = jnp.dot(h, wx, preferred_element_type=jnp.float32) + bx

        if act == "sigmoid":
            out = jax.nn.sigmoid(y)
        elif act == "softmax":
            # Full feature row lives in this block, so a single-pass softmax is
            # safe; mask padded lanes so they don't pollute the denominator.
            if n_valid_out != y.shape[-1]:
                col = jax.lax.broadcasted_iota(jnp.int32, y.shape, 1)
                y = jnp.where(col < n_valid_out, y, -1e30)
            m = jnp.max(y, axis=-1, keepdims=True)
            e = jnp.exp(y - m)
            out = e / jnp.sum(e, axis=-1, keepdims=True)
        else:  # relu
            out = jnp.maximum(y, 0.0)
        o_ref[...] = out.astype(o_ref.dtype)

    return kernel


# ----------------------------------------------------------------------------
# Parameter construction (deterministic, mimics PyTorch nn.Linear default init)
# ----------------------------------------------------------------------------
def _init_linear(key, n_in, n_out):
    kw, kb = jax.random.split(key)
    bound = 1.0 / math.sqrt(n_in)
    # stored as (in, out): transpose of PyTorch's (out, in)
    w = jax.random.uniform(kw, (n_in, n_out), jnp.float32, -bound, bound)
    b = jax.random.uniform(kb, (1, n_out), jnp.float32, -bound, bound)
    return w, b


def _pad2(a, rows, cols):
    return jnp.pad(a, ((0, rows - a.shape[0]), (0, cols - a.shape[1])))


class DecoderPallas:
    """Pallas port of scMVAE.layers.Decoder (eval-mode forward), fully fused."""

    def __init__(self, layer, hidden, input_size, Type="Bernoulli", seed=0):
        self.layer = list(layer)
        self.hidden = hidden
        self.input_size = input_size
        self.Type = Type
        key = jax.random.PRNGKey(seed)

        # ---- unfolded params (kept for the pure-JAX reference and for any
        #      future training-mode BN support) ----
        self.hidden_params = []
        if len(self.layer) > 1:
            for n_in, n_out in zip(self.layer[:-1], self.layer[1:]):
                key, sub = jax.random.split(key)
                w, b = _init_linear(sub, n_in, n_out)
                # BatchNorm1d init: gamma=1, beta=0, running_mean=0,
                # running_var=1, eps=1e-3.
                eps = 0.001
                gamma = jnp.ones((1, n_out), jnp.float32)
                beta = jnp.zeros((1, n_out), jnp.float32)
                running_mean = jnp.zeros((1, n_out), jnp.float32)
                running_var = jnp.ones((1, n_out), jnp.float32)
                scale = gamma / jnp.sqrt(running_var + eps)
                shift = beta - running_mean * scale
                self.hidden_params.append((w, b, scale, shift))

        key, sub = jax.random.split(key)
        self.wx, self.bx = _init_linear(sub, hidden, input_size)

        # ---- folded + lane-padded params used by the fused kernel ----
        self.in_dim = self.layer[0] if len(self.layer) > 1 else hidden
        self.in_dim_p = _round_up(self.in_dim, LANE)
        self.hidden_padded = []
        prev_p = self.in_dim_p
        for (w, b, scale, shift) in self.hidden_params:
            wf = w * scale                 # fold eval-mode BN into the weight
            bf = b * scale + shift         # ... and into the bias
            out_p = _round_up(w.shape[1], LANE)
            self.hidden_padded.append(
                (_pad2(wf, prev_p, out_p), _pad2(bf, 1, out_p)))
            prev_p = out_p
        self.out_p = _round_up(input_size, LANE)
        self.wxp = _pad2(self.wx, prev_p, self.out_p)
        self.bxp = _pad2(self.bx, 1, self.out_p)

        if self.Type in ("Bernoulli", "Gaussian1"):
            self.act = "sigmoid"
        elif self.Type == "Gaussian":
            self.act = "softmax"
        else:
            self.act = "relu"

    def __call__(self, z):
        z = z.astype(jnp.float32)
        B, d_in = z.shape
        # Batch tile: 128 rows when batch is large, else sublane-rounded batch.
        TB = 128 if B >= 128 else _round_up(B, SUBLANE)
        Bp = _round_up(B, TB)
        zp = jnp.pad(z, ((0, Bp - B), (0, self.in_dim_p - d_in)))

        operands = [zp]
        in_specs = [pl.BlockSpec((TB, self.in_dim_p), lambda i: (i, 0))]
        flops = 0
        bytes_acc = zp.size * 4 + Bp * self.out_p * 4
        for (wp, bp) in self.hidden_padded:
            operands += [wp, bp]
            in_specs += [pl.BlockSpec(wp.shape, lambda i: (0, 0)),
                         pl.BlockSpec(bp.shape, lambda i: (0, 0))]
            flops += 2 * Bp * wp.shape[0] * wp.shape[1]
            bytes_acc += (wp.size + bp.size) * 4
        operands += [self.wxp, self.bxp]
        in_specs += [pl.BlockSpec(self.wxp.shape, lambda i: (0, 0)),
                     pl.BlockSpec(self.bxp.shape, lambda i: (0, 0))]
        flops += 2 * Bp * self.wxp.shape[0] * self.wxp.shape[1]
        bytes_acc += (self.wxp.size + self.bxp.size) * 4
        transcend = Bp * self.out_p if self.act in ("sigmoid", "softmax") else 0

        kernel = _make_decoder_kernel(len(self.hidden_padded), self.act,
                                      self.input_size)
        out = pl.pallas_call(
            kernel,
            out_shape=jax.ShapeDtypeStruct((Bp, self.out_p), jnp.float32),
            grid=(Bp // TB,),
            in_specs=in_specs,
            out_specs=pl.BlockSpec((TB, self.out_p), lambda i: (i, 0)),
            compiler_params=pltpu.CompilerParams(
                dimension_semantics=("parallel",)),
            cost_estimate=pl.CostEstimate(
                flops=int(flops), transcendentals=int(transcend),
                bytes_accessed=int(bytes_acc)),
        )(*operands)
        return out[:B, :self.input_size]


# ----------------------------------------------------------------------------
# Pure-JAX reference (uses UNFOLDED params -> also checks the BN fold/padding)
# ----------------------------------------------------------------------------
def _reference(dec, z):
    h = z.astype(jnp.float32)
    for (w, b, scale, shift) in dec.hidden_params:
        h = jnp.maximum((h @ w + b) * scale + shift, 0.0)
    y = h @ dec.wx + dec.bx
    if dec.Type in ("Bernoulli", "Gaussian1"):
        return jax.nn.sigmoid(y)
    elif dec.Type == "Gaussian":
        return jax.nn.softmax(y, axis=1)
    return jnp.maximum(y, 0.0)


if __name__ == "__main__":
    # Small shapes consistent with the module:
    #   layer = [32, 64] (MLP: 32 -> 64), hidden = 64, input_size = 48
    batch = 8
    layer = [32, 64]
    hidden = 64
    input_size = 48

    key = jax.random.PRNGKey(0)
    z = jax.random.normal(key, (batch, layer[0]), jnp.float32)

    # Check both the sigmoid (Bernoulli) and the masked-softmax (Gaussian) paths.
    for typ in ("Bernoulli", "Gaussian"):
        dec = DecoderPallas(layer, hidden, input_size, Type=typ, seed=0)
        out = jax.block_until_ready(dec(z))
        ref = _reference(dec, z)
        assert out.shape == (batch, input_size), out.shape
        assert jnp.all(jnp.isfinite(out))
        assert jnp.allclose(out, ref, atol=1e-5, rtol=1e-5), f"mismatch ({typ})"

    print("KERNEL_OK")
</pallas_src>

<mosaic_0001>
module attributes {stable_mosaic.version = 11 : i64} {
  func.func @kernel(%arg0: i32, %arg1: memref<8x128xf32, #tpu.memory_space<vmem>>, %arg2: memref<128x128xf32, #tpu.memory_space<vmem>>, %arg3: memref<1x128xf32, #tpu.memory_space<vmem>>, %arg4: memref<128x128xf32, #tpu.memory_space<vmem>>, %arg5: memref<1x128xf32, #tpu.memory_space<vmem>>, %arg6: memref<8x128xf32, #tpu.memory_space<vmem>>) attributes {dimension_semantics = [#tpu.dimension_semantics<parallel>], iteration_bounds = array<i64: 1>, scalar_prefetch = 0 : i64, scratch_operands = 0 : i64, tpu.core_type = #tpu.core_type<tc>, window_params = [{transform_indices = @transform_0, window_bounds = array<i64: 8, 128>}, {pipeline_mode = #tpu.pipeline_mode<synchronous>, transform_indices = @transform_1, window_bounds = array<i64: 128, 128>}, {pipeline_mode = #tpu.pipeline_mode<synchronous>, transform_indices = @transform_2, window_bounds = array<i64: 1, 128>}, {pipeline_mode = #tpu.pipeline_mode<synchronous>, transform_indices = @transform_3, window_bounds = array<i64: 128, 128>}, {pipeline_mode = #tpu.pipeline_mode<synchronous>, transform_indices = @transform_4, window_bounds = array<i64: 1, 128>}, {transform_indices = @transform_5, window_bounds = array<i64: 8, 128>}]} {
    %c0 = arith.constant 0 : index
    %c0_0 = arith.constant 0 : index
    %0 = vector.load %arg1[%c0, %c0_0] : memref<8x128xf32, #tpu.memory_space<vmem>>, vector<8x128xf32>
    %c0_1 = arith.constant 0 : index
    %c0_2 = arith.constant 0 : index
    %1 = vector.load %arg2[%c0_1, %c0_2] : memref<128x128xf32, #tpu.memory_space<vmem>>, vector<128x128xf32>
    %c0_3 = arith.constant 0 : index
    %c0_4 = arith.constant 0 : index
    %2 = vector.load %arg3[%c0_3, %c0_4] : memref<1x128xf32, #tpu.memory_space<vmem>>, vector<1x128xf32>
    %cst = arith.constant dense<0.000000e+00> : vector<8x128xf32>
    %3 = tpu.matmul %0, %1, %cst {dimension_numbers = #tpu.dot_dimension_numbers<[1], [0], [0], [1], [0, 0, 1, 1], [], []>} : vector<8x128xf32>, vector<128x128xf32>, vector<8x128xf32> -> vector<8x128xf32>
    %4 = vector.broadcast %2 : vector<1x128xf32> to vector<8x128xf32>
    %5 = arith.addf %3, %4 : vector<8x128xf32>
    %cst_5 = arith.constant 0.000000e+00 : f32
    %6 = vector.broadcast %cst_5 : f32 to vector<8x128xf32>
    %7 = arith.maximumf %5, %6 : vector<8x128xf32>
    %c0_6 = arith.constant 0 : index
    %c0_7 = arith.constant 0 : index
    %8 = vector.load %arg4[%c0_6, %c0_7] : memref<128x128xf32, #tpu.memory_space<vmem>>, vector<128x128xf32>
    %c0_8 = arith.constant 0 : index
    %c0_9 = arith.constant 0 : index
    %9 = vector.load %arg5[%c0_8, %c0_9] : memref<1x128xf32, #tpu.memory_space<vmem>>, vector<1x128xf32>
    %cst_10 = arith.constant dense<0.000000e+00> : vector<8x128xf32>
    %10 = tpu.matmul %7, %8, %cst_10 {dimension_numbers = #tpu.dot_dimension_numbers<[1], [0], [0], [1], [0, 0, 1, 1], [], []>} : vector<8x128xf32>, vector<128x128xf32>, vector<8x128xf32> -> vector<8x128xf32>
    %11 = vector.broadcast %9 : vector<1x128xf32> to vector<8x128xf32>
    %12 = arith.addf %10, %11 : vector<8x128xf32>
    %13 = arith.negf %12 : vector<8x128xf32>
    %14 = math.exp %13 : vector<8x128xf32>
    %cst_11 = arith.constant 1.000000e+00 : f32
    %15 = vector.broadcast %cst_11 : f32 to vector<8x128xf32>
    %16 = arith.addf %15, %14 : vector<8x128xf32>
    %17 = arith.divf %15, %16 : vector<8x128xf32>
    %c0_12 = arith.constant 0 : index
    %c0_13 = arith.constant 0 : index
    %18 = vector.load %arg6[%c0_12, %c0_13] : memref<8x128xf32, #tpu.memory_space<vmem>>, vector<8x128xf32>
    tpu.vector_store %arg6[%c0_12, %c0_13], %17 {strides = array<i32>} : memref<8x128xf32, #tpu.memory_space<vmem>>, vector<8x128xf32>,
    return
  }
  func.func @transform_0(%arg0: i32) -> (i32, i32) {
    %c0_i32 = arith.constant 0 : i32
    %c0_i32_0 = arith.constant 0 : i32
    return %arg0, %c0_i32 : i32, i32
  }
  func.func @transform_1(%arg0: i32) -> (i32, i32) {
    %c0_i32 = arith.constant 0 : i32
    %c0_i32_0 = arith.constant 0 : i32
    %c0_i32_1 = arith.constant 0 : i32
    return %c0_i32, %c0_i32_0 : i32, i32
  }
  func.func @transform_2(%arg0: i32) -> (i32, i32) {
    %c0_i32 = arith.constant 0 : i32
    %c0_i32_0 = arith.constant 0 : i32
    %c0_i32_1 = arith.constant 0 : i32
    return %c0_i32, %c0_i32_0 : i32, i32
  }
  func.func @transform_3(%arg0: i32) -> (i32, i32) {
    %c0_i32 = arith.constant 0 : i32
    %c0_i32_0 = arith.constant 0 : i32
    %c0_i32_1 = arith.constant 0 : i32
    return %c0_i32, %c0_i32_0 : i32, i32
  }
  func.func @transform_4(%arg0: i32) -> (i32, i32) {
    %c0_i32 = arith.constant 0 : i32
    %c0_i32_0 = arith.constant 0 : i32
    %c0_i32_1 = arith.constant 0 : i32
    return %c0_i32, %c0_i32_0 : i32, i32
  }
  func.func @transform_5(%arg0: i32) -> (i32, i32) {
    %c0_i32 = arith.constant 0 : i32
    %c0_i32_0 = arith.constant 0 : i32
    return %arg0, %c0_i32 : i32, i32
  }
}

</mosaic_0001>

<bundles_post_ra>
// kernel: tpu_custom_call.1
= control target key start
LH: loop header
LB: loop body
LE: loop exit
PB: predicated region body
PF: predicated region fallthrough
CT: control target
= control target key end

     0   :  { %10 = vsyncpa [#allocation3], 0  ;;  %s355_s0 = inlined_call_operand.hbm [shape: f32[8,128], index: 0, kind: input, shape index: {}]   ;;  %s356_s1 = inlined_call_operand.hbm [shape: f32[128,128], index: 1, kind: input, shape index: {}]   ;;  %s357_s2 = inlined_call_operand.vmem [shape: f32[1,128], index: 2, kind: input, shape index: {}]   ;;  %s358_s3 = inlined_call_operand.hbm [shape: f32[128,128], index: 3, kind: input, shape index: {}]   ;;  %s359_s4 = inlined_call_operand.vmem [shape: f32[1,128], index: 4, kind: input, shape index: {}]   ;;  %s360_s5 = inlined_call_operand.hbm [shape: f32[8,128], index: 5, kind: output, shape index: {}]  }
   0x1   :  { %11 = vsyncpa [#allocation6], 0  ;;  %s28_s20 = sshll.u32 %s356_s1, 4  ;;  %s29_s20 = int_to_ptr.hbm [resolvable:$true] %s28_s20 }
   0x2   :  { %12 = vsyncpa [#allocation4], 0  ;;  %s301_s21 = smov [#allocation5]   ;;  %s18_s25 = sshll.u32 %s355_s0, 4  ;;  %s19_s25 = int_to_ptr.hbm [resolvable:$true] %s18_s25 }
   0x3   :  { %s30_s22 = sshll.u32 %s301_s21, 4  ;;  %s302_s26 = smov 128   ;;  %s31_s22 = int_to_ptr.vmem [resolvable:$true] %s30_s22 }
   0x4   :  { %s303_s27 = smov 8   ;;  %s304_s28 = smov [#allocation2]  }
   0x5   :  { %36 = dma.hbm_to_vmem [thread:$0]  %s29_s20, 2048, %s31_s22, [#allocation6], %s302_s26, %s302_s26, %s303_s27  }
   0x6   :  { %s20_s29 = sshll.u32 %s304_s28, 4  ;;  %s43_s7 = sshll.u32 %s358_s3, 4  ;;  %s21_s29 = int_to_ptr.vmem [resolvable:$true] %s20_s29  ;;  %s44_s7 = int_to_ptr.hbm [resolvable:$true] %s43_s7 }
   0x7   :  { %23 = dma.hbm_to_vmem [thread:$0]  %s19_s25, 128, %s21_s29, [#allocation3]  }
   0x8   :  { %s305_s1 = smov [#allocation7]  }
   0x9   :  { %s45_s8 = sshll.u32 %s305_s1, 4  ;;  %s46_s8 = int_to_ptr.vmem [resolvable:$true] %s45_s8 }
   0xa   :  { %51 = dma.hbm_to_vmem [thread:$0]  %s44_s7, 2048, %s46_s8, [#allocation6], %s302_s26, %s302_s26, %s303_s27  }
   0xb   :  { %295 = dma.done.wait [#allocation3], 128  }
   0xc   :  { %296 = vsyncadd [#allocation3], 4294967168 }
   0xd   :  { %297 = dma.done.wait [#allocation6], 4096  }
   0xe   :  { %298 = vsyncadd [#allocation6], 4294963200  ;;  %v82_v0 = vld [vmem:[#allocation5 + $0x78] sm:$0xff]  ;;  %v81_v1 = vld [vmem:[#allocation5 + $0x70] sm:$0xff] }
   0xf   :  { %87 = vmatpush.msra.mxu0 %v82_v0  ;;  %v80_v2 = vld [vmem:[#allocation5 + $0x68] sm:$0xff]  ;;  %v79_v3 = vld [vmem:[#allocation5 + $0x60] sm:$0xff]  ;;  %v123_v4 = vld [vmem:[#allocation7 + $0x78] sm:$0xff] }
  0x10   :  { %v78_v5 = vld [vmem:[#allocation5 + $0x58] sm:$0xff]  ;;  %128 = vmatpush.msra.mxu1 %v123_v4  ;;  %v122_v6 = vld [vmem:[#allocation7 + $0x70] sm:$0xff]  ;;  %v121_v7 = vld [vmem:[#allocation7 + $0x68] sm:$0xff] }
  0x11   :  { %88 = vmatpush.msra.mxu0 %v81_v1  ;;  %v77_v8 = vld [vmem:[#allocation5 + $0x50] sm:$0xff]  ;;  %v120_v9 = vld [vmem:[#allocation7 + $0x60] sm:$0xff]  ;;  %v76_v10 = vld [vmem:[#allocation5 + $0x48] sm:$0xff] }
  0x12   :  { %129 = vmatpush.msra.mxu1 %v122_v6  ;;  %v119_v11 = vld [vmem:[#allocation7 + $0x58] sm:$0xff]  ;;  %v75_v12 = vld [vmem:[#allocation5 + $0x40] sm:$0xff]  ;;  %v118_v13 = vld [vmem:[#allocation7 + $0x50] sm:$0xff] }
  0x13   :  { %89 = vmatpush.msra.mxu0 %v80_v2  ;;  %v74_v14 = vld [vmem:[#allocation5 + $0x38] sm:$0xff]  ;;  %v117_v15 = vld [vmem:[#allocation7 + $0x48] sm:$0xff]  ;;  %v73_v16 = vld [vmem:[#allocation5 + $0x30] sm:$0xff] }
  0x14   :  { %130 = vmatpush.msra.mxu1 %v121_v7  ;;  %v116_v17 = vld [vmem:[#allocation7 + $0x40] sm:$0xff]  ;;  %v72_v18 = vld [vmem:[#allocation5 + $0x28] sm:$0xff]  ;;  %v115_v19 = vld [vmem:[#allocation7 + $0x38] sm:$0xff] }
  0x15   :  { %90 = vmatpush.msra.mxu0 %v79_v3  ;;  %v71_v20 = vld [vmem:[#allocation5 + $0x20] sm:$0xff]  ;;  %v114_v21 = vld [vmem:[#allocation7 + $0x30] sm:$0xff]  ;;  %v70_v22 = vld [vmem:[#allocation5 + $0x18] sm:$0xff] }
  0x16   :  { %131 = vmatpush.msra.mxu1 %v120_v9  ;;  %v113_v23 = vld [vmem:[#allocation7 + $0x28] sm:$0xff]  ;;  %v69_v24 = vld [vmem:[#allocation5 + $0x10] sm:$0xff]  ;;  %v112_v25 = vld [vmem:[#allocation7 + $0x20] sm:$0xff] }
  0x17   :  { %91 = vmatpush.msra.mxu0 %v78_v5  ;;  %v68_v26 = vld [vmem:[#allocation5 + $0x8] sm:$0xff]  ;;  %v111_v27 = vld [vmem:[#allocation7 + $0x18] sm:$0xff]  ;;  %v67_v28 = vld [vmem:[#allocation5] sm:$0xff] }
  0x18   :  { %132 = vmatpush.msra.mxu1 %v119_v11  ;;  %v66_v29 = vld [vmem:[#allocation2] sm:$0xff]  ;;  %v110_v30 = vld [vmem:[#allocation7 + $0x10] sm:$0xff]  ;;  %v109_v31 = vld [vmem:[#allocation7 + $0x8] sm:$0xff] }
  0x19   :  { %92 = vmatpush.msra.mxu0 %v77_v8  ;;  %v108_v32 = vld [vmem:[#allocation7] sm:$0xff]  ;;  %v193_v33 = vld [vmem:[%s357_s2] ss:$0 sm:$0xff]  ;;  %s306_s2 = smov [#allocation8]  }
  0x1a   :  { %133 = vmatpush.msra.mxu1 %v118_v13  ;;  %v194_v37 = vld [vmem:[%s359_s4] ss:$0 sm:$0xff]  ;;  %s173_s11 = sshll.u32 %s306_s2, 4  ;;  %s175_s4 = sshll.u32 %s360_s5, 4  ;;  %s174_s11 = int_to_ptr.vmem [resolvable:$true] %s173_s11  ;;  %s176_s4 = int_to_ptr.hbm [resolvable:$true] %s175_s4 }
  0x1b   :  { %93 = vmatpush.msra.mxu0 %v76_v10 }
  0x1c   :  { %134 = vmatpush.msra.mxu1 %v117_v15 }
  0x1d   :  { %94 = vmatpush.msra.mxu0 %v75_v12 }
  0x1e   :  { %135 = vmatpush.msra.mxu1 %v116_v17 }
  0x1f   :  { %95 = vmatpush.msra.mxu0 %v74_v14 }
  0x20   :  { %136 = vmatpush.msra.mxu1 %v115_v19 }
  0x21   :  { %96 = vmatpush.msra.mxu0 %v73_v16 }
  0x22   :  { %137 = vmatpush.msra.mxu1 %v114_v21 }
  0x23   :  { %97 = vmatpush.msra.mxu0 %v72_v18 }
  0x24   :  { %138 = vmatpush.msra.mxu1 %v113_v23 }
  0x25   :  { %98 = vmatpush.msra.mxu0 %v71_v20 }
  0x26   :  { %139 = vmatpush.msra.mxu1 %v112_v25 }
  0x27   :  { %99 = vmatpush.msra.mxu0 %v70_v22 }
  0x28   :  { %140 = vmatpush.msra.mxu1 %v111_v27 }
  0x29   :  { %100 = vmatpush.msra.mxu0 %v69_v24 }
  0x2a   :  { %141 = vmatpush.msra.mxu1 %v110_v30 }
  0x2b   :  { %101 = vmatpush.msra.mxu0 %v68_v26 }
  0x2c   :  { %142 = vmatpush.msra.mxu1 %v109_v31 }
  0x2d   :  { %102 = vmatpush.msra.mxu0 %v67_v28 }
  0x2e   :  { %103 = vmatmul.f32.vlgmr.msra.gmra.mxu0 %v66_v29  ;;  %143 = vmatpush.msra.mxu1 %v108_v32 }
  0xab   :  { %v104_v34 = vpop.f32.mrf.mxu0 }
  0xac   :  { %v105_v35 = vadd.f32 %v193_v33, %v104_v34 }
  0xae   :  { %v107_v36 = vmax.f32 %v105_v35, 0.0 }
  0xb0   :  { %144 = vmatmul.f32.vlgmr.msra.gmra.mxu1 %v107_v36 }
 0x12d   :  { %v145_v38 = vpop.f32.mrf.mxu1 }
 0x12e   :  { %v146_v39 = vadd.f32 %v194_v37, %v145_v38 }
 0x130   :  { %v186_v40 = vmul.f32 -1.442695, %v146_v39 }
 0x132   :  { %195 = vpow2.f32 %v186_v40 }
 0x138   :  { %v196_v41 = vpop.eup %195 }
 0x139   :  { %v151_v42 = vadd.f32 1.0, %v196_v41 }
 0x13b   :  { %197 = vrcp.f32 %v151_v42  ;;  %v163_v46 = vand.u32 2147483648, %v151_v42  ;;  %v161_v48 = vand.u32 2147483647, %v151_v42  ;;  %vm157_vm1 = vweird.f32 %v151_v42 }
 0x13d   :  { %v164_v50 = vor.u32 1.1754944e-38, %v163_v46  ;;  %vm162_vm3 = vcmp.eq.f32.partialorder %v161_v48, 8.507059e+37 }
 0x141   :  { %v198_v43 = vpop.eup %197 }
 0x142   :  { %v153_v44 = vmul.f32 %v198_v43, %v151_v42  ;;  %vm158_vm0 = vweird.f32 %v198_v43 }
 0x143   :  { %vm159_vm2 = vmor %vm157_vm1, %vm158_vm0 }
 0x144   :  { %v154_v45 = vsub.f32 1.0, %v153_v44 }
 0x146   :  { %v155_v47 = vmul.f32 %v198_v43, %v154_v45 }
 0x148   :  { %v156_v49 = vadd.f32 %v198_v43, %v155_v47 }
 0x14a   :  { %v160_v51 = vsel %vm159_vm2, %v198_v43, %v156_v49 }
 0x14b   :  { %v165_v52 = vsel %vm162_vm3, %v164_v50, %v160_v51 }
 0x14c   :  { %167 = vst [vmem:[#allocation8] sm:$0xff] %v165_v52 }
 0x14d   :  { %178 = dma.vmem_to_hbm [thread:$0]  %s174_s11, 128, %s176_s4, [#allocation4]  }
 0x14e   :  { %299 = dma.done.wait [#allocation4], 128  }
 0x14f   :  { %300 = vsyncadd [#allocation4], 4294967168 }
 0x150   :  { %183 = vsyncpa [#allocation3], 1 }
 0x151   :  { %184 = vsyncpa [#allocation6], 1 }
 0x152   :  { %185 = vsyncpa [#allocation4], 1 }

</bundles_post_ra>
